<compile_context>
chip_gen: v7x
topology: tpu7x:2x2x1
jax: 0.10.0
libtpu: 0.0.40
codegen_flags: <defaults>
</compile_context>

<pallas_src>
import jax
import jax.numpy as jnp
from jax.experimental import pallas as pl
from jax.experimental.pallas import tpu as pltpu


_MAX_DMA_CHUNKS = 4          # a few large concurrent DMAs, one semaphore each
_MIN_CHUNK_BYTES = 1 << 20   # don't split below ~1 MiB per chunk


def _num_chunks(leading: int, total_bytes: int) -> int:
    if leading <= 1:
        return 1
    by_size = max(1, total_bytes // _MIN_CHUNK_BYTES)
    return int(min(_MAX_DMA_CHUNKS, leading, by_size))


def _chunk_bounds(n: int, n_chunks: int):
    """Static (start, size) chunks covering [0, n) along the leading axis."""
    base, rem = divmod(n, n_chunks)
    bounds = []
    start = 0
    for i in range(n_chunks):
        size = base + (1 if i < rem else 0)
        if size > 0:
            bounds.append((start, size))
            start += size
    return tuple(bounds)


def _make_hbm_copy_kernel(chunk_bounds):
    """Kernel body: direct HBM -> HBM DMA copy over a few large chunks."""

    def kernel(x_ref, o_ref, sem):
        copies = []
        if len(chunk_bounds) == 1:
            # Single whole-array DMA (no slicing at all).
            cp = pltpu.make_async_copy(x_ref, o_ref, sem.at[0])
            cp.start()
            copies.append(cp)
        else:
            for i, (start, size) in enumerate(chunk_bounds):
                cp = pltpu.make_async_copy(
                    x_ref.at[pl.ds(start, size)],
                    o_ref.at[pl.ds(start, size)],
                    sem.at[i],
                )
                cp.start()
                copies.append(cp)
        # Start all first (concurrent DMA queues), then wait all.
        for cp in copies:
            cp.wait()

    return kernel


def _identity_copy_pallas(x: jax.Array) -> jax.Array:
    orig_shape = x.shape
    if x.size == 0:
        return x  # nothing to copy

    # 0-d arrays: lift to 1-d so the DMA has an axis (layout-free reshape).
    xin = x.reshape((1,)) if x.ndim == 0 else x

    total_bytes = xin.size * jnp.dtype(xin.dtype).itemsize
    bounds = _chunk_bounds(xin.shape[0], _num_chunks(xin.shape[0], total_bytes))

    out = pl.pallas_call(
        _make_hbm_copy_kernel(bounds),
        out_shape=jax.ShapeDtypeStruct(xin.shape, xin.dtype),
        in_specs=[pl.BlockSpec(memory_space=pl.ANY)],   # stay in HBM, no auto-DMA
        out_specs=pl.BlockSpec(memory_space=pl.ANY),    # output allocated in HBM
        scratch_shapes=[pltpu.SemaphoreType.DMA((len(bounds),))],
    )(xin)
    return out.reshape(orig_shape)


def weight_noise_layer_forward(x, *, enabled: bool = False,
                               force_kernel: bool = False):
    """Pallas implementation of WeightNoiseLayer.forward (identity).

    `enabled` mirrors the module's `_enabled` flag; exactly as in the PyTorch
    module it has no effect on the forward computation.  The default path
    returns `x` with zero data movement (the correct optimization for an
    identity op).  `force_kernel=True` runs a Pallas kernel that performs a
    genuine HBM->HBM DMA copy (no VMEM bounce, no aliasing/donation needed).
    """
    del enabled  # flag does not affect forward semantics
    if x is None:
        return None
    if not force_kernel:
        return x
    return _identity_copy_pallas(x)


if __name__ == "__main__":
    key = jax.random.PRNGKey(0)
    # NCHW-style input matching PyTorch conventions.
    x = jax.random.normal(key, (2, 4, 16, 16), dtype=jnp.float32)

    # Default (optimized) path: true pass-through, no data movement.
    y_fast = weight_noise_layer_forward(x, enabled=False)
    assert y_fast is x

    # Kernel path: HBM -> HBM DMA copy.
    y = weight_noise_layer_forward(x, enabled=True, force_kernel=True)
    y = jax.block_until_ready(y)
    assert y.shape == x.shape, (y.shape, x.shape)
    assert y.dtype == x.dtype, (y.dtype, x.dtype)
    assert bool(jnp.all(y == x)), "identity forward mismatch"

    # Ragged minor dims + bf16: same DMA path, no reshape/relayout needed.
    x2 = jax.random.normal(jax.random.PRNGKey(0), (3, 5, 7), dtype=jnp.bfloat16)
    y2 = jax.block_until_ready(weight_noise_layer_forward(x2, force_kernel=True))
    assert y2.shape == x2.shape and y2.dtype == x2.dtype
    assert bool(jnp.all(y2 == x2)), "ragged identity mismatch"

    # Larger tensor: exercises the multi-chunk concurrent-DMA path (4 x 1 MiB).
    x3 = jax.random.normal(jax.random.PRNGKey(0), (8, 256, 512), dtype=jnp.float32)
    y3 = jax.block_until_ready(weight_noise_layer_forward(x3, force_kernel=True))
    assert y3.shape == x3.shape and y3.dtype == x3.dtype
    assert bool(jnp.all(y3 == x3)), "chunked identity mismatch"

    print("KERNEL_OK")
</pallas_src>

<mosaic_0001>
module attributes {stable_mosaic.version = 11 : i64} {
  func.func @kernel(%arg0: memref<2x4x16x16xf32, #tpu.memory_space<any>>, %arg1: memref<2x4x16x16xf32, #tpu.memory_space<any>>, %arg2: memref<1x!tpu.dma_semaphore, #tpu.memory_space<semaphore_mem>>) attributes {dimension_semantics = [], scalar_prefetch = 0 : i64, scratch_operands = 1 : i64, tpu.core_type = #tpu.core_type<tc>} {
    %c0_i32 = arith.constant 0 : i32
    %0 = tpu.memref_slice %arg2[%c0_i32] : memref<1x!tpu.dma_semaphore, #tpu.memory_space<semaphore_mem>> -> memref<1x!tpu.dma_semaphore, #tpu.memory_space<semaphore_mem>>
    %1 = tpu.memref_squeeze %0 : memref<1x!tpu.dma_semaphore, #tpu.memory_space<semaphore_mem>> -> memref<!tpu.dma_semaphore, #tpu.memory_space<semaphore_mem>>
    tpu.enqueue_dma source(%arg0 : memref<2x4x16x16xf32, #tpu.memory_space<any>>) target(%arg1 : memref<2x4x16x16xf32, #tpu.memory_space<any>>) target_semaphore(%1 : memref<!tpu.dma_semaphore, #tpu.memory_space<semaphore_mem>>)
    %c0_i32_0 = arith.constant 0 : i32
    %2 = tpu.memref_slice %arg2[%c0_i32_0] : memref<1x!tpu.dma_semaphore, #tpu.memory_space<semaphore_mem>> -> memref<1x!tpu.dma_semaphore, #tpu.memory_space<semaphore_mem>>
    %3 = tpu.memref_squeeze %2 : memref<1x!tpu.dma_semaphore, #tpu.memory_space<semaphore_mem>> -> memref<!tpu.dma_semaphore, #tpu.memory_space<semaphore_mem>>
    tpu.wait_dma2 semaphore(%3 : memref<!tpu.dma_semaphore, #tpu.memory_space<semaphore_mem>>) src(%arg0 : memref<2x4x16x16xf32, #tpu.memory_space<any>>) dst(%arg1 : memref<2x4x16x16xf32, #tpu.memory_space<any>>)
    return
  }
}

</mosaic_0001>

<bundles_post_ra>
// kernel: tpu_custom_call.1
= control target key start
LH: loop header
LB: loop body
LE: loop exit
PB: predicated region body
PF: predicated region fallthrough
CT: control target
= control target key end

     0   :  { %s36_s6 = smov [#allocation2]   ;;  %s37_s7 = smov [#allocation3]   ;;  %s55_s0 = inlined_call_operand.hbm [shape: f32[2,4,16,16], index: 0, kind: input, shape index: {}]   ;;  %s56_s1 = inlined_call_operand.hbm [shape: f32[2,4,16,16], index: 1, kind: output, shape index: {}]  }
   0x1   :  { %s38_s8 = smov 0  }
   0x2   :  { %18 = dma.general %s55_s0, 2048, %s56_s1, %s36_s6, %s37_s7, [#allocation4], %s38_s8, 0  }
   0x3   :  { %34 = dma.done.wait [#allocation2], 2048 }
   0x4   :  { %35 = vsyncadd [#allocation2], 4294965248 }
   0x5   :  { %24 = vsyncmov [#allocation2] }
   0x8   :  { %s25_s13 = vpop.sfrf %24 }
   0x9   :  { %p30_p0 = scmp.ne.s32.totalorder %s25_s13, 0 }
   0xb   :  { %29 = shalt.err (%p30_p0)  }

</bundles_post_ra>
